<compile_context>
chip_gen: v7x
topology: tpu7x:2x2x1
jax: 0.10.0
libtpu: 0.0.40
codegen_flags: <defaults>
</compile_context>

<pallas_src>
import jax
import jax.numpy as jnp
from jax.experimental import pallas as pl
from jax.experimental.pallas import tpu as pltpu


def caption_attention_kernel(cap_ref, wc_ref, bias_ref, out_ref):
    # cap_ref:  (bb, S, E) captions block (the only large DMA stream)
    # wc_ref:   (1, E)     folded caption weights  (w1 @ w2)[:E]
    # bias_ref: (bb, 1)    per-batch folded visual + bias term
    # out_ref:  (bb, S)    softmax weights, lane-dense over S
    cap = cap_ref[...]
    wc = wc_ref[...]
    bias = bias_ref[...]

    # Folded-linear caption scores: VPU multiply + lane reduce over E (no MXU,
    # no N=1 matmul).
    cap_score = jnp.sum(cap * wc[None, :, :], axis=-1)           # (bb, S)

    # ReLU(Linear2(Linear1(concat))) with both Linears algebraically folded;
    # the visual contribution is the per-batch scalar `bias`.
    logits = jnp.maximum(cap_score + bias, jnp.float32(0.0))     # (bb, S)

    # Softmax over the sequence (lane) axis.  NOTE: every batch row is
    # independent; rows past B in a padded last block hold garbage and are
    # dropped on the masked store -- do NOT introduce any cross-row reduction.
    m = jnp.max(logits, axis=-1, keepdims=True)                  # (bb, 1)
    p = jnp.exp(logits - m)                                      # (bb, S)
    denom = jnp.sum(p, axis=-1, keepdims=True)                   # (bb, 1)
    inv = pl.reciprocal(denom, approx=True)                      # EUP approx 1/x
    inv = inv * (jnp.float32(2.0) - denom * inv)                 # 1 Newton step -> f32
    out_ref[...] = p * inv                                       # (bb, S)


_LANE = 128
_SUBLANE = 8
_BLOCK_VMEM_BUDGET = 16 * 1024 * 1024   # double-buffered block bytes per grid step
_SCOPED_VMEM_LIMIT = 32 * 1024 * 1024   # safe on v5e/v6e (128 MiB phys) and v7x (64 MiB)


def _tpu_num_tensorcores():
    """Best-effort TensorCore count (v7x = 2, v5e/v6e = 1); conservative fallback."""
    try:
        vmem = int(pltpu.get_tpu_info().vmem_capacity_bytes)
    except Exception:
        vmem = 128 * 1024 * 1024          # v5e/v6e default -> single-TC path
    # v7x: 64 MiB VMEM per TensorCore, 2 TCs/chip.  v5e/v6e: 128 MiB, 1 TC.
    return 2 if vmem <= 64 * 1024 * 1024 else 1


def _pick_batch_block(B, S, E, num_cores):
    """Batch rows per grid step, sized from a VMEM budget.  S is never tiled."""
    # Per-batch-row bytes of ONE buffer, rounded up to (8, 128) tiles, f32.
    cap_row = max(S, _SUBLANE) * max(E, _LANE) * 4
    out_row = max(S, _LANE) * 4
    bias_row = _LANE * 4
    row_bytes = 2 * (cap_row + out_row + bias_row)    # x2: double buffering
    bb = max(1, _BLOCK_VMEM_BUDGET // row_bytes)
    bb = min(bb, B)
    # Multi-TC chips (v7x): split the batch only when every core can get >= 2
    # grid steps with sublane-aligned blocks (DMA/compute overlap).  Single-TC
    # chips (v5e/v6e): one big block wins (per-step overhead dominates).
    min_steps = 2 * num_cores
    if num_cores > 1 and B >= min_steps * _SUBLANE:
        bb = min(bb, B // min_steps)
    # Partial blocks must keep the sublane-adjacent output dim a multiple of 8
    # (the (8,128) block-shape rule); a block covering the whole batch is exempt.
    if bb < B:
        bb = max(_SUBLANE, (bb // _SUBLANE) * _SUBLANE)
        bb = min(bb, B)
    return bb


def caption_attention(vis_input, captions, w1, b1, w2, b2):
    """vis_input: (B, R, F), captions: (B, S, E).
    w1: (E+F, A), b1: (A,), w2: (A, 1), b2: (1,). Returns (B, S, 1)."""
    B, R, F = vis_input.shape
    _, S, E = captions.shape

    # --- wrapper-side algebraic folds (exact; no nonlinearity between linears) ---
    # Linear2(Linear1(x)) = x @ (w1 @ w2) + (b1 @ w2 + b2)
    w_eff = (w1 @ w2).astype(jnp.float32)                        # (E+F, 1)
    b_eff = (b1 @ w2 + b2).astype(jnp.float32)                   # (1,)
    wc = w_eff[:E].reshape(1, E)                                 # folded caption weights
    wv = w_eff[E:]                                               # (F, 1) folded visual weights
    # Entire visual branch -> one per-batch scalar (only B*F flops in the wrapper).
    mean_vis = jnp.mean(vis_input.astype(jnp.float32), axis=1)   # (B, F)
    bias_b = (mean_vis @ wv + b_eff).reshape(B, 1)               # (B, 1)

    captions = captions.astype(jnp.float32)

    num_cores = _tpu_num_tensorcores()
    bb = _pick_batch_block(B, S, E, num_cores)
    num_blocks = pl.cdiv(B, bb)

    out = pl.pallas_call(
        caption_attention_kernel,
        out_shape=jax.ShapeDtypeStruct((B, S), jnp.float32),
        grid_spec=pltpu.PrefetchScalarGridSpec(
            num_scalar_prefetch=0,
            grid=(num_blocks,),
            in_specs=[
                pl.BlockSpec((bb, S, E), lambda i: (i, 0, 0)),   # captions (big stream)
                pl.BlockSpec((1, E), lambda i: (0, 0)),          # folded caption weights
                pl.BlockSpec((bb, 1), lambda i: (i, 0)),         # per-batch folded bias
            ],
            out_specs=pl.BlockSpec((bb, S), lambda i: (i, 0)),   # lane-dense (B, S)
        ),
        compiler_params=pltpu.CompilerParams(
            dimension_semantics=("parallel",),
            vmem_limit_bytes=_SCOPED_VMEM_LIMIT),
    )(captions, wc, bias_b)

    # (B, S) -> (B, S, 1): identical linear element order, free reshape.
    return out.reshape(B, S, 1)


def caption_attention_ref(vis_input, captions, w1, b1, w2, b2):
    """Pure-JAX reference mirroring the PyTorch forward."""
    B, R, F = vis_input.shape
    S = captions.shape[1]
    mean_v = jnp.mean(vis_input, axis=1)                       # (B, F)
    mean_v = jnp.broadcast_to(mean_v[:, None, :], (B, S, F))   # (B, S, F)
    attn_input = jnp.concatenate([captions, mean_v], axis=2)   # (B, S, E+F)
    h = attn_input @ w1 + b1                                   # (B, S, A)
    logits = jnp.maximum(h @ w2 + b2, 0.0)                     # (B, S, 1)
    return jax.nn.softmax(logits, axis=1)


if __name__ == "__main__":
    # Small shapes consistent with the module's forward:
    B, R, F = 2, 16, 32       # batch, image regions, feature_dim
    S, E = 8, 32              # caption seq length, embed_dim (caplen)
    A = 512                   # attention_dim (hardcoded in the module)

    key = jax.random.PRNGKey(0)
    k_vis, k_cap, k_w1, k_b1, k_w2, k_b2 = jax.random.split(key, 6)

    vis_input = jax.random.normal(k_vis, (B, R, F), dtype=jnp.float32)
    captions = jax.random.normal(k_cap, (B, S, E), dtype=jnp.float32)

    # Deterministic parameter init (shapes from nn.Linear(E+F, A), nn.Linear(A, 1)),
    # stored as (in, out).
    s1 = 1.0 / jnp.sqrt(jnp.float32(E + F))
    s2 = 1.0 / jnp.sqrt(jnp.float32(A))
    w1 = jax.random.uniform(k_w1, (E + F, A), jnp.float32, -s1, s1)
    b1 = jax.random.uniform(k_b1, (A,), jnp.float32, -s1, s1)
    w2 = jax.random.uniform(k_w2, (A, 1), jnp.float32, -s2, s2)
    b2 = jax.random.uniform(k_b2, (1,), jnp.float32, -s2, s2)

    out = caption_attention(vis_input, captions, w1, b1, w2, b2)
    out = jax.block_until_ready(out)

    ref = caption_attention_ref(vis_input, captions, w1, b1, w2, b2)
    assert out.shape == (B, S, 1)
    assert jnp.allclose(out, ref, atol=1e-5, rtol=1e-5), "mismatch vs reference"

    print("KERNEL_OK")
</pallas_src>

<mosaic_0001>
module attributes {stable_mosaic.version = 11 : i64} {
  func.func @caption_attention_kernel(%arg0: i32, %arg1: memref<2x8x32xf32, #tpu.memory_space<vmem>>, %arg2: memref<1x32xf32, #tpu.memory_space<vmem>>, %arg3: memref<2x1xf32, #tpu.memory_space<vmem>>, %arg4: memref<2x8xf32, #tpu.memory_space<vmem>>) attributes {dimension_semantics = [#tpu.dimension_semantics<parallel>], iteration_bounds = array<i64: 1>, scalar_prefetch = 0 : i64, scratch_operands = 0 : i64, tpu.core_type = #tpu.core_type<tc>, window_params = [{transform_indices = @transform_0, window_bounds = array<i64: 2, 8, 32>}, {pipeline_mode = #tpu.pipeline_mode<synchronous>, transform_indices = @transform_1, window_bounds = array<i64: 1, 32>}, {transform_indices = @transform_2, window_bounds = array<i64: 2, 1>}, {transform_indices = @transform_3, window_bounds = array<i64: 2, 8>}]} {
    %c0 = arith.constant 0 : index
    %c0_0 = arith.constant 0 : index
    %c0_1 = arith.constant 0 : index
    %0 = vector.load %arg1[%c0, %c0_0, %c0_1] : memref<2x8x32xf32, #tpu.memory_space<vmem>>, vector<2x8x32xf32>
    %c0_2 = arith.constant 0 : index
    %c0_3 = arith.constant 0 : index
    %1 = vector.load %arg2[%c0_2, %c0_3] : memref<1x32xf32, #tpu.memory_space<vmem>>, vector<1x32xf32>
    %c0_4 = arith.constant 0 : index
    %c0_5 = arith.constant 0 : index
    %2 = vector.load %arg3[%c0_4, %c0_5] : memref<2x1xf32, #tpu.memory_space<vmem>>, vector<2x1xf32>
    %3 = vector.shape_cast %1 : vector<1x32xf32> to vector<1x1x32xf32>
    %4 = vector.broadcast %3 : vector<1x1x32xf32> to vector<2x8x32xf32>
    %5 = arith.mulf %0, %4 : vector<2x8x32xf32>
    %cst = arith.constant dense<0.000000e+00> : vector<2x8xf32>
    %6 = vector.multi_reduction <add>, %5, %cst [2] : vector<2x8x32xf32> to vector<2x8xf32>
    %7 = vector.broadcast %2 : vector<2x1xf32> to vector<2x8xf32>
    %8 = arith.addf %6, %7 : vector<2x8xf32>
    %cst_6 = arith.constant 0.000000e+00 : f32
    %9 = vector.broadcast %cst_6 : f32 to vector<2x8xf32>
    %10 = arith.maximumf %8, %9 : vector<2x8xf32>
    %cst_7 = arith.constant dense<0xFF800000> : vector<2xf32>
    %11 = vector.multi_reduction <maximumf>, %10, %cst_7 [1] : vector<2x8xf32> to vector<2xf32>
    %12 = vector.shape_cast %11 : vector<2xf32> to vector<2x1xf32>
    %13 = vector.broadcast %12 : vector<2x1xf32> to vector<2x8xf32>
    %14 = arith.subf %10, %13 : vector<2x8xf32>
    %15 = math.exp %14 : vector<2x8xf32>
    %cst_8 = arith.constant dense<0.000000e+00> : vector<2xf32>
    %16 = vector.multi_reduction <add>, %15, %cst_8 [1] : vector<2x8xf32> to vector<2xf32>
    %17 = vector.shape_cast %16 : vector<2xf32> to vector<2x1xf32>
    %18 = tpu.reciprocal %17 {approx = true} : vector<2x1xf32> -> vector<2x1xf32>
    %19 = arith.mulf %17, %18 : vector<2x1xf32>
    %cst_9 = arith.constant 2.000000e+00 : f32
    %20 = vector.broadcast %cst_9 : f32 to vector<2x1xf32>
    %21 = arith.subf %20, %19 : vector<2x1xf32>
    %22 = arith.mulf %18, %21 : vector<2x1xf32>
    %23 = vector.broadcast %22 : vector<2x1xf32> to vector<2x8xf32>
    %24 = arith.mulf %15, %23 : vector<2x8xf32>
    %c0_10 = arith.constant 0 : index
    %c0_11 = arith.constant 0 : index
    %25 = vector.load %arg4[%c0_10, %c0_11] : memref<2x8xf32, #tpu.memory_space<vmem>>, vector<2x8xf32>
    tpu.vector_store %arg4[%c0_10, %c0_11], %24 {strides = array<i32>} : memref<2x8xf32, #tpu.memory_space<vmem>>, vector<2x8xf32>,
    return
  }
  func.func @transform_0(%arg0: i32) -> (i32, i32, i32) {
    %c0_i32 = arith.constant 0 : i32
    %c0_i32_0 = arith.constant 0 : i32
    %c0_i32_1 = arith.constant 0 : i32
    return %arg0, %c0_i32, %c0_i32_0 : i32, i32, i32
  }
  func.func @transform_1(%arg0: i32) -> (i32, i32) {
    %c0_i32 = arith.constant 0 : i32
    %c0_i32_0 = arith.constant 0 : i32
    %c0_i32_1 = arith.constant 0 : i32
    return %c0_i32, %c0_i32_0 : i32, i32
  }
  func.func @transform_2(%arg0: i32) -> (i32, i32) {
    %c0_i32 = arith.constant 0 : i32
    %c0_i32_0 = arith.constant 0 : i32
    return %arg0, %c0_i32 : i32, i32
  }
  func.func @transform_3(%arg0: i32) -> (i32, i32) {
    %c0_i32 = arith.constant 0 : i32
    %c0_i32_0 = arith.constant 0 : i32
    return %arg0, %c0_i32 : i32, i32
  }
}

</mosaic_0001>

<bundles_post_ra>
// kernel: tpu_custom_call.1
= control target key start
LH: loop header
LB: loop body
LE: loop exit
PB: predicated region body
PF: predicated region fallthrough
CT: control target
= control target key end

     0   :  { %8 = vsyncpa [#allocation3], 0  ;;  %s311_s0 = inlined_call_operand.hbm [shape: f32[2,8,32], index: 0, kind: input, shape index: {}]   ;;  %s312_s1 = inlined_call_operand.vmem [shape: f32[1,32], index: 1, kind: input, shape index: {}]   ;;  %s313_s2 = inlined_call_operand.vmem [shape: f32[2,1], index: 2, kind: input, shape index: {}]   ;;  %s314_s3 = inlined_call_operand.hbm [shape: f32[2,8], index: 3, kind: output, shape index: {}]  }
   0x1   :  { %9 = vsyncpa [#allocation4], 0  ;;  %s242_s12 = smov [#allocation2]   ;;  %s194_s16 = scalar_lea.hbm %s311_s0, 256 }
   0x2   :  { %s15_s13 = sshll.u32 %s242_s12, 4  ;;  %p195_p0 = scmp.ne.s32.totalorder %s311_s0, %s194_s16  ;;  %s16_s13 = int_to_ptr.vmem [resolvable:$true] %s15_s13 }
   0x3   :  { %p198_p1 = scmp.lt.u32.totalorder %s194_s16, %s311_s0 }
   0x5   :  { %p200_p2 = pnand %p198_p1, %p195_p0 }
   0x7   :  { %203 = shalt.err (!%p200_p2)
}
   0x8   :  { %s204_s21 = scalar_lea.vmem %s16_s13, 256  ;;  %p209_p4 = scmp.lt.s32.totalorder %s16_s13, %s16_s13 }
   0x9   :  { %p205_p3 = scmp.ne.s32.totalorder %s16_s13, %s204_s21  ;;  %p210_p5 = scmp.lt.s32.totalorder %s204_s21, %s204_s21 }
   0xb   :  { %p211_p6 = por %p210_p5, %p209_p4 }
   0xd   :  { %p212_p7 = pnand %p211_p6, %p205_p3 }
   0xf   :  { %215 = shalt.err (!%p212_p7)
}
  0x10   :  { %s243_s22 = smov 128   ;;  %s244_s23 = smov 8  }
  0x11   :  { %21 = dma.hbm_to_vmem [thread:$0]  %s311_s0, 256, %s16_s13, [#allocation3], %s243_s22, %s243_s22, %s244_s23  }
  0x12   :  { %238 = dma.done.wait [#allocation3], 256  }
  0x13   :  { %239 = vsyncadd [#allocation3], 4294967040  ;;  %v52_v0 = vlaneseq  ;;  %v245_v1 = vmov 0   ;;  %v29_v5 = vld [vmem:[#allocation2] sm:$0xff]  ;;  %vm41_vm0 = vcmask 261120   ;;  %v30_v7 = vld [vmem:[#allocation2 + $0x8] sm:$0xff] }
  0x14   :  { %186 = vset.pattern.permute.xlu1 %v245_v1  ;;  %187 = vset.pattern.permute.xlu0 %v245_v1  ;;  %v180_v6 = vld [vmem:[%s312_s1] ss:$0 sm:$0xff]  ;;  %vm84_vm1 = vcmask 1041409   ;;  %vm87_vm2 = vcmask 58368   ;;  %s246_s1 = smov [#allocation5]  }
  0x15   :  { %v53_v2 = vshrl.u32 %v52_v0, 7  ;;  %v75_v3 = vand.u32 127, %v52_v0  ;;  %v39_v8 = vmul.f32 %v180_v6, %v29_v5  ;;  %v40_v9 = vmul.f32 %v180_v6, %v30_v7  ;;  %v32_v10 = vld [vmem:[%s313_s2] sm:$0x3]  ;;  %s171_s2 = sshll.u32 %s246_s1, 4  ;;  %s172_s2 = int_to_ptr.vmem [resolvable:$true] %s171_s2 }
  0x16   :  { %50 = vperm.xlu1 %186, %v32_v10   ;;  %s216_s29 = scalar_lea.vmem %s172_s2, 32  ;;  %p221_p9 = scmp.lt.s32.totalorder %s172_s2, %s172_s2 }
  0x17   :  { %v279_v4 = vsub.s32 %v75_v3, %v53_v2  ;;  %v42_v11 = vsel %vm41_vm0, %v39_v8, 0.0  ;;  %v45_v12 = vsel %vm41_vm0, %v40_v9, 0.0  ;;  %v54_v13 = vsub.s32 0, %v53_v2  ;;  %p217_p8 = scmp.ne.s32.totalorder %s172_s2, %s216_s29  ;;  %p222_p10 = scmp.lt.s32.totalorder %s216_s29, %s216_s29 }
  0x18   :  { %43 = vadd.xlane.f32.xlu0 %v42_v11  ;;  %v58_v15 = vsub.s32 1, %v53_v2 }
  0x19   :  { %p223_p11 = por %p222_p10, %p221_p9 }
  0x1b   :  { %p224_p12 = pnand %p223_p11, %p217_p8 }
  0x1c   :  { %46 = vadd.xlane.f32.xlu0 %v45_v12 }
  0x95   :  { %v51_v14 = vpop.permute.xlu1 %50 }
  0x96   :  { %v55_v16 = vrot.slane %v51_v14, %v54_v13  ;;  %v59_v18 = vrot.slane %v51_v14, %v58_v15 }
  0xa5   :  { %v44_v17 = vpop.xlane.xlu0 %43 }
  0xa6   :  { %v62_v19 = vadd.f32 %v55_v16, %v44_v17 }
  0xa8   :  { %v64_v20 = vmax.f32 %v62_v19, 0.0 }
  0xa9   :  { %v47_v21 = vpop.xlane.xlu0 %46 }
  0xaa   :  { %v63_v22 = vadd.f32 %v59_v18, %v47_v21  ;;  %69 = vperm.xlu1 %186, %v64_v20  }
  0xac   :  { %v65_v23 = vmax.f32 %v63_v22, 0.0 }
  0xae   :  { %72 = vperm.xlu0 %187, %v65_v23  }
 0x129   :  { %v70_v24 = vpop.permute.xlu1 %69 }
 0x12a   :  { %v79_v26 = vrot.slane %v70_v24, %v279_v4 }
 0x12d   :  { %v73_v25 = vpop.permute.xlu0 %72 }
 0x12e   :  { %v83_v27 = vrot.slane %v73_v25, %v279_v4 }
 0x130   :  { %v85_v28 = vsel %vm84_vm1, %v83_v27, %v79_v26 }
 0x131   :  { %v88_v29 = vsel %vm87_vm2, %v85_v28, -inf }
 0x132   :  { %89 = vmax.xlane.f32.xlu1 %v88_v29 }
 0x1bf   :  { %v90_v30 = vpop.xlane.xlu1 %89 }
 0x1c0   :  { %v95_v31 = vrot.slane %v90_v30, %v54_v13  ;;  %v99_v32 = vrot.slane %v90_v30, %v58_v15 }
 0x1c2   :  { %v102_v33 = vsub.f32 %v64_v20, %v95_v31  ;;  %v103_v34 = vsub.f32 %v65_v23, %v99_v32 }
 0x1c4   :  { %v104_v35 = vmul.f32 1.442695, %v102_v33  ;;  %v106_v36 = vmul.f32 1.442695, %v103_v34 }
 0x1c6   :  { %188 = vpow2.f32 %v104_v35 }
 0x1c7   :  { %190 = vpow2.f32 %v106_v36 }
 0x1d0   :  { %v189_v37 = vpop.eup %188 }
 0x1d1   :  { %v191_v38 = vpop.eup %190  ;;  %111 = vperm.xlu1 %186, %v189_v37  }
 0x1d2   :  { %114 = vperm.xlu0 %187, %v191_v38  }
 0x250   :  { %v112_v39 = vpop.permute.xlu1 %111 }
 0x251   :  { %v115_v40 = vpop.permute.xlu0 %114  ;;  %v119_v41 = vrot.slane %v112_v39, %v279_v4 }
 0x252   :  { %v123_v42 = vrot.slane %v115_v40, %v279_v4 }
 0x254   :  { %v124_v43 = vsel %vm84_vm1, %v123_v42, %v119_v41 }
 0x255   :  { %v126_v44 = vsel %vm87_vm2, %v124_v43, 0.0 }
 0x256   :  { %127 = vadd.xlane.f32.xlu0 %v126_v44 }
 0x2e3   :  { %v128_v45 = vpop.xlane.xlu0 %127 }
 0x2e4   :  { %192 = vrcp.f32 %v128_v45 }
 0x2ee   :  { %v193_v46 = vpop.eup %192 }
 0x2ef   :  { %v130_v47 = vmul.f32 %v193_v46, %v128_v45 }
 0x2f1   :  { %v131_v48 = vsub.f32 2.0, %v130_v47 }
 0x2f3   :  { %v132_v49 = vmul.f32 %v193_v46, %v131_v48 }
 0x2f5   :  { %v137_v50 = vrot.slane %v132_v49, %v54_v13  ;;  %v141_v51 = vrot.slane %v132_v49, %v58_v15 }
 0x2f7   :  { %v144_v52 = vmul.f32 %v189_v37, %v137_v50  ;;  %v145_v53 = vmul.f32 %v191_v38, %v141_v51 }
 0x2f9   :  { %149 = vperm.xlu1 %186, %v144_v52  }
 0x2fd   :  { %152 = vperm.xlu1 %186, %v145_v53  }
 0x378   :  { %v150_v54 = vpop.permute.xlu1 %149 }
 0x379   :  { %v157_v56 = vrot.slane %v150_v54, %v279_v4 }
 0x37c   :  { %v153_v55 = vpop.permute.xlu1 %152 }
 0x37d   :  { %v161_v57 = vrot.slane %v153_v55, %v279_v4 }
 0x37f   :  { %v162_v58 = vsel %vm84_vm1, %v161_v57, %v157_v56 }
 0x380   :  { %164 = vst.msk [vmem:[#allocation5] sm:$0x3] %vm87_vm2, %v162_v58 }
 0x381   :  { %227 = shalt.err (!%p224_p12)
}
 0x382   :  { %s228_s5 = scalar_lea.hbm %s314_s3, 32 }
 0x383   :  { %p229_p13 = scmp.ne.s32.totalorder %s314_s3, %s228_s5  ;;  %p232_p0 = scmp.lt.u32.totalorder %s228_s5, %s314_s3 }
 0x385   :  { %p234_p1 = pnand %p232_p0, %p229_p13 }
 0x387   :  { %237 = shalt.err (!%p234_p1)
}
 0x388   :  { %174 = dma.vmem_to_hbm [thread:$0]  %s172_s2, 32, %s314_s3, [#allocation4]  }
 0x389   :  { %240 = dma.done.wait [#allocation4], 32  }
 0x38a   :  { %241 = vsyncadd [#allocation4], 4294967264 }
 0x38b   :  { %178 = vsyncpa [#allocation3], 1 }
 0x38c   :  { %179 = vsyncpa [#allocation4], 1 }

</bundles_post_ra>
